<compile_context>
chip_gen: v5e
topology: v5e:2x2
jax: 0.10.0
libtpu: 0.0.40
codegen_flags: <defaults>
</compile_context>

<pallas_src>
import functools

import jax
import jax.numpy as jnp
from jax import lax
from jax.experimental import pallas as pl
from jax.experimental.pallas import tpu as pltpu


def _round8(n):
    return (n + 7) // 8 * 8


# --------------------------------------------------------------------------- #
# Lane-dense packed weight blob (BN folded).
#
# Global block (rows [0:grows)):
#   lanes [0:emb)      rows [0:in_rows)        lin_in weight
#   lanes [emb:2emb)   row 0                   lin_in bias
# Per-layer block l (rows [grows + l*lrows : ... + lrows)):
#   lanes [0:emb)      rows [0:2emb+edge_dim)  message Linear1 [W1i; W1j; W1e]
#   lanes [emb:2emb)   rows [0:emb)            message Linear2 (BN folded)
#   lanes [2emb:3emb)  rows [0:2emb)           update  Linear1 [Uh; Ua]
#   lanes [3emb:4emb)  rows [0:emb)            update  Linear2 (BN folded)
#   lanes [4emb:5emb)  rows 0..3               biases  [mb1; mb2'; ub1; ub2']
# --------------------------------------------------------------------------- #
def _fold_and_pack(p, *, L, emb, edge_dim, in_rows, grows, lrows, eps=1e-5):
    # BN(x) = (x-mean)/sqrt(var+eps)*gamma + beta = x*scale + shift
    # relu(BN(m) @ W2 + b2) == relu(m @ (diag(scale)@W2) + (shift@W2 + b2))
    ms = p["m_gamma"] / jnp.sqrt(p["m_var"] + eps)
    msh = p["m_beta"] - p["m_mean"] * ms
    mw2f = p["mw2"] * jnp.swapaxes(ms, 1, 2)
    mb2f = jnp.matmul(msh, p["mw2"]) + p["mb2"]

    us = p["u_gamma"] / jnp.sqrt(p["u_var"] + eps)
    ush = p["u_beta"] - p["u_mean"] * us
    uw2f = p["uw2"] * jnp.swapaxes(us, 1, 2)
    ub2f = jnp.matmul(ush, p["uw2"]) + p["ub2"]

    blob = jnp.zeros((grows + L * lrows, 128), jnp.float32)
    blob = blob.at[0:in_rows, 0:emb].set(p["win"].astype(jnp.float32))
    blob = blob.at[0:1, emb:2 * emb].set(p["bin"].astype(jnp.float32))
    for l in range(L):
        b = grows + l * lrows
        w1 = jnp.concatenate([p["mw1i"][l], p["mw1j"][l], p["mw1e"][l]], 0)
        uw1 = jnp.concatenate([p["uw1h"][l], p["uw1a"][l]], 0)
        bias = jnp.concatenate([p["mb1"][l], mb2f[l], p["ub1"][l], ub2f[l]], 0)
        blob = blob.at[b:b + 2 * emb + edge_dim, 0:emb].set(w1)
        blob = blob.at[b:b + emb, emb:2 * emb].set(mw2f[l])
        blob = blob.at[b:b + 2 * emb, 2 * emb:3 * emb].set(uw1)
        blob = blob.at[b:b + emb, 3 * emb:4 * emb].set(uw2f[l])
        blob = blob.at[b:b + 4, 4 * emb:5 * emb].set(bias)
    return blob


# --------------------------------------------------------------------------- #
# Kernel
# --------------------------------------------------------------------------- #
def mpnn_kernel(idx_ref, feat_ref, w_ref, hg_ref, *, dims):
    f32 = jnp.float32
    N, E, G, L = dims["N"], dims["E"], dims["G"], dims["L"]
    emb, edge_dim = dims["emb"], dims["edge_dim"]
    in_rows, N8 = dims["in_rows"], dims["N8"]
    grows, lrows = dims["grows"], dims["lrows"]

    hfeat = feat_ref[0:N, 0:in_rows]                 # (N, atom+3)
    edge_attr = feat_ref[N8:N8 + E, 0:edge_dim]      # (E, edge_dim)

    dstsrc_c = idx_ref[0:2 * E, 0:1]                 # (2E,1) column [dst;src]
    dst_r = idx_ref[0:1, 1:1 + E]                    # (1,E)  dst row
    batch_r = idx_ref[1:2, 1:1 + N]                  # (1,N)  graph-id row

    # ---- loop-invariant one-hot operators (built once, reused by all layers)
    DSr = (lax.broadcasted_iota(jnp.int32, (2 * E, N), 1)
           == dstsrc_c).astype(f32)                                  # [D; S]
    Dt = (lax.broadcasted_iota(jnp.int32, (N, E), 0) == dst_r).astype(f32)
    P = (lax.broadcasted_iota(jnp.int32, (G, N), 0) == batch_r).astype(f32)
    counts = jnp.maximum(jnp.sum(P, axis=1, keepdims=True), 1.0)
    P = P / counts                                    # mean-pool folded into P

    # h = lin_in(cat([x, pos], -1))
    h = (jnp.dot(hfeat, w_ref[0:in_rows, 0:emb], preferred_element_type=f32)
         + w_ref[0:1, emb:2 * emb])

    for l in range(L):
        b = grows + l * lrows
        w1 = w_ref[b:b + 2 * emb + edge_dim, 0:emb]          # [W1i; W1j; W1e]
        mw2 = w_ref[b:b + emb, emb:2 * emb]                   # BN-folded
        uw1 = w_ref[b:b + 2 * emb, 2 * emb:3 * emb]           # [Uh; Ua]
        uw2 = w_ref[b:b + emb, 3 * emb:4 * emb]               # BN-folded
        mb1 = w_ref[b + 0:b + 1, 4 * emb:5 * emb]
        mb2 = w_ref[b + 1:b + 2, 4 * emb:5 * emb]
        ub1 = w_ref[b + 2:b + 3, 4 * emb:5 * emb]
        ub2 = w_ref[b + 3:b + 4, 4 * emb:5 * emb]

        # fused gather: one dot yields [h_i ; h_j] row-stacked
        hij = jnp.dot(DSr, h, preferred_element_type=f32)            # (2E,emb)
        # message MLP first layer as ONE dot over the lane-concat
        cat_m = jnp.concatenate([hij[0:E], hij[E:2 * E], edge_attr], axis=1)
        m = jnp.maximum(jnp.dot(cat_m, w1, preferred_element_type=f32) + mb1,
                        0.0)
        m = jnp.maximum(jnp.dot(m, mw2, preferred_element_type=f32) + mb2, 0.0)

        # scatter-add onto target nodes (transposed one-hot, hoisted)
        aggr = jnp.dot(Dt, m, preferred_element_type=f32)            # (N, emb)

        # update MLP first layer as ONE dot over cat([h, aggr])
        cat_u = jnp.concatenate([h, aggr], axis=1)                   # (N, 2emb)
        u = jnp.maximum(jnp.dot(cat_u, uw1, preferred_element_type=f32) + ub1,
                        0.0)
        u = jnp.maximum(jnp.dot(u, uw2, preferred_element_type=f32) + ub2, 0.0)

        h = h + u                      # residual: h = h + conv(h, ...)

    # global_mean_pool (1/count already folded into P); lin_pred in wrapper
    hg_ref[...] = jnp.dot(P, h, preferred_element_type=f32)


# --------------------------------------------------------------------------- #
# Wrapper
# --------------------------------------------------------------------------- #
@functools.partial(jax.jit, static_argnames=("num_graphs",))
def mpnn_pallas(params, x, pos, edge_index, edge_attr, batch, num_graphs):
    N, atom_features = x.shape
    E = edge_index.shape[1]
    edge_dim = edge_attr.shape[1]
    in_rows = atom_features + pos.shape[1]
    emb = params["win"].shape[1]
    L = params["mw1i"].shape[0]
    G = num_graphs
    N8 = _round8(N)
    grows = _round8(in_rows)
    lrows = _round8(max(2 * emb + edge_dim, 2 * emb, 4))
    assert 5 * emb <= 128, "lane-packed layout requires 5*emb <= 128"

    w_blob = _fold_and_pack(params, L=L, emb=emb, edge_dim=edge_dim,
                            in_rows=in_rows, grows=grows, lrows=lrows)

    # float blob: node features on top, edge_attr (zero-padded cols) below
    feat = jnp.zeros((N8 + E, in_rows), jnp.float32)
    feat = feat.at[:N, :].set(jnp.concatenate([x, pos], -1).astype(jnp.float32))
    feat = feat.at[N8:N8 + E, :edge_dim].set(edge_attr.astype(jnp.float32))

    # single int tensor:
    #   column 0, rows [0:2E)  = [dst ; src]   (gather one-hot, column layout)
    #   row 0,    cols [1:1+E) = dst           (scatter one-hot, row layout)
    #   row 1,    cols [1:1+N) = batch         (pooling one-hot, row layout)
    dst = edge_index[1].astype(jnp.int32)
    src = edge_index[0].astype(jnp.int32)
    R = max(2 * E, 2)
    C = 1 + max(E, N)
    idx = jnp.zeros((R, C), jnp.int32)
    idx = idx.at[0:E, 0].set(dst)
    idx = idx.at[E:2 * E, 0].set(src)
    idx = idx.at[0, 1:1 + E].set(dst)
    idx = idx.at[1, 1:1 + N].set(batch.astype(jnp.int32))

    dims = dict(N=N, E=E, G=G, L=L, emb=emb, edge_dim=edge_dim,
                in_rows=in_rows, N8=N8, grows=grows, lrows=lrows)
    kernel = functools.partial(mpnn_kernel, dims=dims)

    vmem = pl.BlockSpec(memory_space=pltpu.MemorySpace.VMEM)
    hg = pl.pallas_call(
        kernel,
        out_shape=jax.ShapeDtypeStruct((G, emb), jnp.float32),
        in_specs=[vmem, vmem, vmem],
        out_specs=vmem,
    )(idx, feat, w_blob)

    # lin_pred kept in XLA: keeps the kernel's output store lane-shaped (G,emb)
    out = hg @ params["wpred"] + params["bpred"]
    return out.reshape(-1)


# --------------------------------------------------------------------------- #
# Parameters + pure-JAX reference (unfolded BN, scatter-based) for validation
# --------------------------------------------------------------------------- #
def init_params(key, num_layers=4, emb_dim=11, atom_features=11, edge_dim=4,
                out_dim=1):
    keys = iter(jax.random.split(key, 64))

    def nrm(shape, s=0.2):
        return jax.random.normal(next(keys), shape, jnp.float32) * s

    L, e = num_layers, emb_dim
    p = {}
    p["win"] = nrm((atom_features + 3, e))
    p["bin"] = nrm((1, e))

    w1 = nrm((L, 2 * e + edge_dim, e))
    p["mw1i"], p["mw1j"], p["mw1e"] = w1[:, :e], w1[:, e:2 * e], w1[:, 2 * e:]
    p["mb1"] = nrm((L, 1, e))
    p["m_gamma"] = 1.0 + nrm((L, 1, e), 0.05)
    p["m_beta"] = nrm((L, 1, e), 0.05)
    p["m_mean"] = nrm((L, 1, e), 0.1)                 # nonzero running stats
    p["m_var"] = 1.0 + jnp.abs(nrm((L, 1, e), 0.1))
    p["mw2"] = nrm((L, e, e))
    p["mb2"] = nrm((L, 1, e))

    uw1 = nrm((L, 2 * e, e))
    p["uw1h"], p["uw1a"] = uw1[:, :e], uw1[:, e:]
    p["ub1"] = nrm((L, 1, e))
    p["u_gamma"] = 1.0 + nrm((L, 1, e), 0.05)
    p["u_beta"] = nrm((L, 1, e), 0.05)
    p["u_mean"] = nrm((L, 1, e), 0.1)
    p["u_var"] = 1.0 + jnp.abs(nrm((L, 1, e), 0.1))
    p["uw2"] = nrm((L, e, e))                         # was missing (KeyError)
    p["ub2"] = nrm((L, 1, e))                         # was missing (KeyError)

    p["wpred"] = nrm((e, out_dim))
    p["bpred"] = nrm((1, out_dim))
    return p


def mpnn_reference(params, x, pos, edge_attr, edge_index, batch, num_graphs,
                   eps=1e-5):
    p = params
    relu = jax.nn.relu
    h = jnp.concatenate([x, pos], -1) @ p["win"] + p["bin"]
    src, dst = edge_index[0], edge_index[1]
    N, e = h.shape
    L = p["mw1i"].shape[0]
    for l in range(L):
        h_i, h_j = h[dst], h[src]
        m = relu(h_i @ p["mw1i"][l] + h_j @ p["mw1j"][l]
                 + edge_attr @ p["mw1e"][l] + p["mb1"][l])
        m = ((m - p["m_mean"][l]) / jnp.sqrt(p["m_var"][l] + eps)
             * p["m_gamma"][l] + p["m_beta"][l])
        m = relu(m @ p["mw2"][l] + p["mb2"][l])
        aggr = jnp.zeros((N, e), jnp.float32).at[dst].add(m)
        u = relu(h @ p["uw1h"][l] + aggr @ p["uw1a"][l] + p["ub1"][l])
        u = ((u - p["u_mean"][l]) / jnp.sqrt(p["u_var"][l] + eps)
             * p["u_gamma"][l] + p["u_beta"][l])
        u = relu(u @ p["uw2"][l] + p["ub2"][l])
        h = h + u
    counts = jnp.zeros((num_graphs,), jnp.float32).at[batch].add(1.0)
    hg = jnp.zeros((num_graphs, e), jnp.float32).at[batch].add(h) / counts[:, None]
    return (hg @ p["wpred"] + p["bpred"]).reshape(-1)


if __name__ == "__main__":
    key = jax.random.PRNGKey(0)
    kp, kx, kpos, ke, kea = jax.random.split(key, 5)

    N, E, G = 8, 16, 2
    atom_features, edge_dim = 11, 4

    params = init_params(kp)
    x = jax.random.normal(kx, (N, atom_features), jnp.float32)
    pos = jax.random.normal(kpos, (N, 3), jnp.float32)
    edge_index = jax.random.randint(ke, (2, E), 0, N, jnp.int32)
    edge_attr = jax.random.normal(kea, (E, edge_dim), jnp.float32)
    batch = jnp.array([0] * 4 + [1] * 4, jnp.int32)

    out = mpnn_pallas(params, x, pos, edge_index, edge_attr, batch, G)
    out = jax.block_until_ready(out)

    ref = mpnn_reference(params, x, pos, edge_attr, edge_index, batch, G)
    assert out.shape == (G,)
    assert jnp.allclose(out, ref, rtol=1e-4, atol=1e-4), (out, ref)
    print("KERNEL_OK")
</pallas_src>

<mosaic_0001>
module attributes {stable_mosaic.version = 11 : i64} {
  func.func @mpnn_kernel(%arg0: memref<32x17xi32, #tpu.memory_space<vmem>>, %arg1: memref<24x14xf32, #tpu.memory_space<vmem>>, %arg2: memref<144x128xf32, #tpu.memory_space<vmem>>, %arg3: memref<2x11xf32, #tpu.memory_space<vmem>>) attributes {dimension_semantics = [], scalar_prefetch = 0 : i64, scratch_operands = 0 : i64, tpu.core_type = #tpu.core_type<tc>} {
    %c0 = arith.constant 0 : index
    %c0_0 = arith.constant 0 : index
    %0 = vector.load %arg1[%c0, %c0_0] : memref<24x14xf32, #tpu.memory_space<vmem>>, vector<8x14xf32>
    %c8 = arith.constant 8 : index
    %c0_1 = arith.constant 0 : index
    %1 = vector.load %arg1[%c8, %c0_1] : memref<24x14xf32, #tpu.memory_space<vmem>>, vector<16x4xf32>
    %c0_2 = arith.constant 0 : index
    %c0_3 = arith.constant 0 : index
    %2 = vector.load %arg0[%c0_2, %c0_3] : memref<32x17xi32, #tpu.memory_space<vmem>>, vector<32x1xi32>
    %c0_4 = arith.constant 0 : index
    %c1 = arith.constant 1 : index
    %3 = vector.load %arg0[%c0_4, %c1] : memref<32x17xi32, #tpu.memory_space<vmem>>, vector<1x16xi32>
    %c1_5 = arith.constant 1 : index
    %c1_6 = arith.constant 1 : index
    %4 = vector.load %arg0[%c1_5, %c1_6] : memref<32x17xi32, #tpu.memory_space<vmem>>, vector<1x8xi32>
    %5 = tpu.iota {dimensions = array<i32: 1>} : vector<32x8xi32>
    %6 = vector.broadcast %2 : vector<32x1xi32> to vector<32x8xi32>
    %7 = arith.cmpi eq, %5, %6 : vector<32x8xi32>
    %8 = arith.extui %7 : vector<32x8xi1> to vector<32x8xi32>
    %9 = arith.sitofp %8 : vector<32x8xi32> to vector<32x8xf32>
    %10 = tpu.iota {dimensions = array<i32: 0>} : vector<8x16xi32>
    %11 = vector.broadcast %3 : vector<1x16xi32> to vector<8x16xi32>
    %12 = arith.cmpi eq, %10, %11 : vector<8x16xi32>
    %13 = arith.extui %12 : vector<8x16xi1> to vector<8x16xi32>
    %14 = arith.sitofp %13 : vector<8x16xi32> to vector<8x16xf32>
    %15 = tpu.iota {dimensions = array<i32: 0>} : vector<2x8xi32>
    %16 = vector.broadcast %4 : vector<1x8xi32> to vector<2x8xi32>
    %17 = arith.cmpi eq, %15, %16 : vector<2x8xi32>
    %18 = arith.extui %17 : vector<2x8xi1> to vector<2x8xi32>
    %19 = arith.sitofp %18 : vector<2x8xi32> to vector<2x8xf32>
    %cst = arith.constant dense<0.000000e+00> : vector<2xf32>
    %20 = vector.multi_reduction <add>, %19, %cst [1] : vector<2x8xf32> to vector<2xf32>
    %21 = vector.shape_cast %20 : vector<2xf32> to vector<2x1xf32>
    %cst_7 = arith.constant 1.000000e+00 : f32
    %22 = vector.broadcast %cst_7 : f32 to vector<2x1xf32>
    %23 = arith.maximumf %21, %22 : vector<2x1xf32>
    %24 = vector.broadcast %23 : vector<2x1xf32> to vector<2x8xf32>
    %25 = arith.divf %19, %24 : vector<2x8xf32>
    %c0_8 = arith.constant 0 : index
    %c0_9 = arith.constant 0 : index
    %26 = vector.load %arg2[%c0_8, %c0_9] : memref<144x128xf32, #tpu.memory_space<vmem>>, vector<14x11xf32>
    %cst_10 = arith.constant dense<0.000000e+00> : vector<8x11xf32>
    %27 = tpu.matmul %0, %26, %cst_10 {dimension_numbers = #tpu.dot_dimension_numbers<[1], [0], [0], [1], [0, 0, 1, 1], [], []>} : vector<8x14xf32>, vector<14x11xf32>, vector<8x11xf32> -> vector<8x11xf32>
    %c0_11 = arith.constant 0 : index
    %c11 = arith.constant 11 : index
    %28 = vector.load %arg2[%c0_11, %c11] : memref<144x128xf32, #tpu.memory_space<vmem>>, vector<1x11xf32>
    %29 = vector.broadcast %28 : vector<1x11xf32> to vector<8x11xf32>
    %30 = arith.addf %27, %29 : vector<8x11xf32>
    %c16 = arith.constant 16 : index
    %c0_12 = arith.constant 0 : index
    %31 = vector.load %arg2[%c16, %c0_12] : memref<144x128xf32, #tpu.memory_space<vmem>>, vector<26x11xf32>
    %c16_13 = arith.constant 16 : index
    %c11_14 = arith.constant 11 : index
    %32 = vector.load %arg2[%c16_13, %c11_14] : memref<144x128xf32, #tpu.memory_space<vmem>>, vector<11x11xf32>
    %c16_15 = arith.constant 16 : index
    %c22 = arith.constant 22 : index
    %33 = vector.load %arg2[%c16_15, %c22] : memref<144x128xf32, #tpu.memory_space<vmem>>, vector<22x11xf32>
    %c16_16 = arith.constant 16 : index
    %c33 = arith.constant 33 : index
    %34 = vector.load %arg2[%c16_16, %c33] : memref<144x128xf32, #tpu.memory_space<vmem>>, vector<11x11xf32>
    %c16_17 = arith.constant 16 : index
    %c44 = arith.constant 44 : index
    %35 = vector.load %arg2[%c16_17, %c44] : memref<144x128xf32, #tpu.memory_space<vmem>>, vector<1x11xf32>
    %c17 = arith.constant 17 : index
    %c44_18 = arith.constant 44 : index
    %36 = vector.load %arg2[%c17, %c44_18] : memref<144x128xf32, #tpu.memory_space<vmem>>, vector<1x11xf32>
    %c18 = arith.constant 18 : index
    %c44_19 = arith.constant 44 : index
    %37 = vector.load %arg2[%c18, %c44_19] : memref<144x128xf32, #tpu.memory_space<vmem>>, vector<1x11xf32>
    %c19 = arith.constant 19 : index
    %c44_20 = arith.constant 44 : index
    %38 = vector.load %arg2[%c19, %c44_20] : memref<144x128xf32, #tpu.memory_space<vmem>>, vector<1x11xf32>
    %cst_21 = arith.constant dense<0.000000e+00> : vector<32x11xf32>
    %39 = tpu.matmul %9, %30, %cst_21 {dimension_numbers = #tpu.dot_dimension_numbers<[1], [0], [0], [1], [0, 0, 1, 1], [], []>} : vector<32x8xf32>, vector<8x11xf32>, vector<32x11xf32> -> vector<32x11xf32>
    %40 = vector.extract_strided_slice %39 {offsets = [0, 0], sizes = [16, 11], strides = [1, 1]} : vector<32x11xf32> to vector<16x11xf32>
    %41 = vector.extract_strided_slice %39 {offsets = [16, 0], sizes = [16, 11], strides = [1, 1]} : vector<32x11xf32> to vector<16x11xf32>
    %42 = tpu.concatenate %40, %41, %1 in 1 : vector<16x11xf32>, vector<16x11xf32>, vector<16x4xf32> -> vector<16x26xf32>
    %cst_22 = arith.constant dense<0.000000e+00> : vector<16x11xf32>
    %43 = tpu.matmul %42, %31, %cst_22 {dimension_numbers = #tpu.dot_dimension_numbers<[1], [0], [0], [1], [0, 0, 1, 1], [], []>} : vector<16x26xf32>, vector<26x11xf32>, vector<16x11xf32> -> vector<16x11xf32>
    %44 = vector.broadcast %35 : vector<1x11xf32> to vector<16x11xf32>
    %45 = arith.addf %43, %44 : vector<16x11xf32>
    %cst_23 = arith.constant 0.000000e+00 : f32
    %46 = vector.broadcast %cst_23 : f32 to vector<16x11xf32>
    %47 = arith.maximumf %45, %46 : vector<16x11xf32>
    %cst_24 = arith.constant dense<0.000000e+00> : vector<16x11xf32>
    %48 = tpu.matmul %47, %32, %cst_24 {dimension_numbers = #tpu.dot_dimension_numbers<[1], [0], [0], [1], [0, 0, 1, 1], [], []>} : vector<16x11xf32>, vector<11x11xf32>, vector<16x11xf32> -> vector<16x11xf32>
    %49 = vector.broadcast %36 : vector<1x11xf32> to vector<16x11xf32>
    %50 = arith.addf %48, %49 : vector<16x11xf32>
    %cst_25 = arith.constant 0.000000e+00 : f32
    %51 = vector.broadcast %cst_25 : f32 to vector<16x11xf32>
    %52 = arith.maximumf %50, %51 : vector<16x11xf32>
    %cst_26 = arith.constant dense<0.000000e+00> : vector<8x11xf32>
    %53 = tpu.matmul %14, %52, %cst_26 {dimension_numbers = #tpu.dot_dimension_numbers<[1], [0], [0], [1], [0, 0, 1, 1], [], []>} : vector<8x16xf32>, vector<16x11xf32>, vector<8x11xf32> -> vector<8x11xf32>
    %54 = tpu.concatenate %30, %53 in 1 : vector<8x11xf32>, vector<8x11xf32> -> vector<8x22xf32>
    %cst_27 = arith.constant dense<0.000000e+00> : vector<8x11xf32>
    %55 = tpu.matmul %54, %33, %cst_27 {dimension_numbers = #tpu.dot_dimension_numbers<[1], [0], [0], [1], [0, 0, 1, 1], [], []>} : vector<8x22xf32>, vector<22x11xf32>, vector<8x11xf32> -> vector<8x11xf32>
    %56 = vector.broadcast %37 : vector<1x11xf32> to vector<8x11xf32>
    %57 = arith.addf %55, %56 : vector<8x11xf32>
    %cst_28 = arith.constant 0.000000e+00 : f32
    %58 = vector.broadcast %cst_28 : f32 to vector<8x11xf32>
    %59 = arith.maximumf %57, %58 : vector<8x11xf32>
    %cst_29 = arith.constant dense<0.000000e+00> : vector<8x11xf32>
    %60 = tpu.matmul %59, %34, %cst_29 {dimension_numbers = #tpu.dot_dimension_numbers<[1], [0], [0], [1], [0, 0, 1, 1], [], []>} : vector<8x11xf32>, vector<11x11xf32>, vector<8x11xf32> -> vector<8x11xf32>
    %61 = vector.broadcast %38 : vector<1x11xf32> to vector<8x11xf32>
    %62 = arith.addf %60, %61 : vector<8x11xf32>
    %cst_30 = arith.constant 0.000000e+00 : f32
    %63 = vector.broadcast %cst_30 : f32 to vector<8x11xf32>
    %64 = arith.maximumf %62, %63 : vector<8x11xf32>
    %65 = arith.addf %30, %64 : vector<8x11xf32>
    %c48 = arith.constant 48 : index
    %c0_31 = arith.constant 0 : index
    %66 = vector.load %arg2[%c48, %c0_31] : memref<144x128xf32, #tpu.memory_space<vmem>>, vector<26x11xf32>
    %c48_32 = arith.constant 48 : index
    %c11_33 = arith.constant 11 : index
    %67 = vector.load %arg2[%c48_32, %c11_33] : memref<144x128xf32, #tpu.memory_space<vmem>>, vector<11x11xf32>
    %c48_34 = arith.constant 48 : index
    %c22_35 = arith.constant 22 : index
    %68 = vector.load %arg2[%c48_34, %c22_35] : memref<144x128xf32, #tpu.memory_space<vmem>>, vector<22x11xf32>
    %c48_36 = arith.constant 48 : index
    %c33_37 = arith.constant 33 : index
    %69 = vector.load %arg2[%c48_36, %c33_37] : memref<144x128xf32, #tpu.memory_space<vmem>>, vector<11x11xf32>
    %c48_38 = arith.constant 48 : index
    %c44_39 = arith.constant 44 : index
    %70 = vector.load %arg2[%c48_38, %c44_39] : memref<144x128xf32, #tpu.memory_space<vmem>>, vector<1x11xf32>
    %c49 = arith.constant 49 : index
    %c44_40 = arith.constant 44 : index
    %71 = vector.load %arg2[%c49, %c44_40] : memref<144x128xf32, #tpu.memory_space<vmem>>, vector<1x11xf32>
    %c50 = arith.constant 50 : index
    %c44_41 = arith.constant 44 : index
    %72 = vector.load %arg2[%c50, %c44_41] : memref<144x128xf32, #tpu.memory_space<vmem>>, vector<1x11xf32>
    %c51 = arith.constant 51 : index
    %c44_42 = arith.constant 44 : index
    %73 = vector.load %arg2[%c51, %c44_42] : memref<144x128xf32, #tpu.memory_space<vmem>>, vector<1x11xf32>
    %cst_43 = arith.constant dense<0.000000e+00> : vector<32x11xf32>
    %74 = tpu.matmul %9, %65, %cst_43 {dimension_numbers = #tpu.dot_dimension_numbers<[1], [0], [0], [1], [0, 0, 1, 1], [], []>} : vector<32x8xf32>, vector<8x11xf32>, vector<32x11xf32> -> vector<32x11xf32>
    %75 = vector.extract_strided_slice %74 {offsets = [0, 0], sizes = [16, 11], strides = [1, 1]} : vector<32x11xf32> to vector<16x11xf32>
    %76 = vector.extract_strided_slice %74 {offsets = [16, 0], sizes = [16, 11], strides = [1, 1]} : vector<32x11xf32> to vector<16x11xf32>
    %77 = tpu.concatenate %75, %76, %1 in 1 : vector<16x11xf32>, vector<16x11xf32>, vector<16x4xf32> -> vector<16x26xf32>
    %cst_44 = arith.constant dense<0.000000e+00> : vector<16x11xf32>
    %78 = tpu.matmul %77, %66, %cst_44 {dimension_numbers = #tpu.dot_dimension_numbers<[1], [0], [0], [1], [0, 0, 1, 1], [], []>} : vector<16x26xf32>, vector<26x11xf32>, vector<16x11xf32> -> vector<16x11xf32>
    %79 = vector.broadcast %70 : vector<1x11xf32> to vector<16x11xf32>
    %80 = arith.addf %78, %79 : vector<16x11xf32>
    %cst_45 = arith.constant 0.000000e+00 : f32
    %81 = vector.broadcast %cst_45 : f32 to vector<16x11xf32>
    %82 = arith.maximumf %80, %81 : vector<16x11xf32>
    %cst_46 = arith.constant dense<0.000000e+00> : vector<16x11xf32>
    %83 = tpu.matmul %82, %67, %cst_46 {dimension_numbers = #tpu.dot_dimension_numbers<[1], [0], [0], [1], [0, 0, 1, 1], [], []>} : vector<16x11xf32>, vector<11x11xf32>, vector<16x11xf32> -> vector<16x11xf32>
    %84 = vector.broadcast %71 : vector<1x11xf32> to vector<16x11xf32>
    %85 = arith.addf %83, %84 : vector<16x11xf32>
    %cst_47 = arith.constant 0.000000e+00 : f32
    %86 = vector.broadcast %cst_47 : f32 to vector<16x11xf32>
    %87 = arith.maximumf %85, %86 : vector<16x11xf32>
    %cst_48 = arith.constant dense<0.000000e+00> : vector<8x11xf32>
    %88 = tpu.matmul %14, %87, %cst_48 {dimension_numbers = #tpu.dot_dimension_numbers<[1], [0], [0], [1], [0, 0, 1, 1], [], []>} : vector<8x16xf32>, vector<16x11xf32>, vector<8x11xf32> -> vector<8x11xf32>
    %89 = tpu.concatenate %65, %88 in 1 : vector<8x11xf32>, vector<8x11xf32> -> vector<8x22xf32>
    %cst_49 = arith.constant dense<0.000000e+00> : vector<8x11xf32>
    %90 = tpu.matmul %89, %68, %cst_49 {dimension_numbers = #tpu.dot_dimension_numbers<[1], [0], [0], [1], [0, 0, 1, 1], [], []>} : vector<8x22xf32>, vector<22x11xf32>, vector<8x11xf32> -> vector<8x11xf32>
    %91 = vector.broadcast %72 : vector<1x11xf32> to vector<8x11xf32>
    %92 = arith.addf %90, %91 : vector<8x11xf32>
    %cst_50 = arith.constant 0.000000e+00 : f32
    %93 = vector.broadcast %cst_50 : f32 to vector<8x11xf32>
    %94 = arith.maximumf %92, %93 : vector<8x11xf32>
    %cst_51 = arith.constant dense<0.000000e+00> : vector<8x11xf32>
    %95 = tpu.matmul %94, %69, %cst_51 {dimension_numbers = #tpu.dot_dimension_numbers<[1], [0], [0], [1], [0, 0, 1, 1], [], []>} : vector<8x11xf32>, vector<11x11xf32>, vector<8x11xf32> -> vector<8x11xf32>
    %96 = vector.broadcast %73 : vector<1x11xf32> to vector<8x11xf32>
    %97 = arith.addf %95, %96 : vector<8x11xf32>
    %cst_52 = arith.constant 0.000000e+00 : f32
    %98 = vector.broadcast %cst_52 : f32 to vector<8x11xf32>
    %99 = arith.maximumf %97, %98 : vector<8x11xf32>
    %100 = arith.addf %65, %99 : vector<8x11xf32>
    %c80 = arith.constant 80 : index
    %c0_53 = arith.constant 0 : index
    %101 = vector.load %arg2[%c80, %c0_53] : memref<144x128xf32, #tpu.memory_space<vmem>>, vector<26x11xf32>
    %c80_54 = arith.constant 80 : index
    %c11_55 = arith.constant 11 : index
    %102 = vector.load %arg2[%c80_54, %c11_55] : memref<144x128xf32, #tpu.memory_space<vmem>>, vector<11x11xf32>
    %c80_56 = arith.constant 80 : index
    %c22_57 = arith.constant 22 : index
    %103 = vector.load %arg2[%c80_56, %c22_57] : memref<144x128xf32, #tpu.memory_space<vmem>>, vector<22x11xf32>
    %c80_58 = arith.constant 80 : index
    %c33_59 = arith.constant 33 : index
    %104 = vector.load %arg2[%c80_58, %c33_59] : memref<144x128xf32, #tpu.memory_space<vmem>>, vector<11x11xf32>
    %c80_60 = arith.constant 80 : index
    %c44_61 = arith.constant 44 : index
    %105 = vector.load %arg2[%c80_60, %c44_61] : memref<144x128xf32, #tpu.memory_space<vmem>>, vector<1x11xf32>
    %c81 = arith.constant 81 : index
    %c44_62 = arith.constant 44 : index
    %106 = vector.load %arg2[%c81, %c44_62] : memref<144x128xf32, #tpu.memory_space<vmem>>, vector<1x11xf32>
    %c82 = arith.constant 82 : index
    %c44_63 = arith.constant 44 : index
    %107 = vector.load %arg2[%c82, %c44_63] : memref<144x128xf32, #tpu.memory_space<vmem>>, vector<1x11xf32>
    %c83 = arith.constant 83 : index
    %c44_64 = arith.constant 44 : index
    %108 = vector.load %arg2[%c83, %c44_64] : memref<144x128xf32, #tpu.memory_space<vmem>>, vector<1x11xf32>
    %cst_65 = arith.constant dense<0.000000e+00> : vector<32x11xf32>
    %109 = tpu.matmul %9, %100, %cst_65 {dimension_numbers = #tpu.dot_dimension_numbers<[1], [0], [0], [1], [0, 0, 1, 1], [], []>} : vector<32x8xf32>, vector<8x11xf32>, vector<32x11xf32> -> vector<32x11xf32>
    %110 = vector.extract_strided_slice %109 {offsets = [0, 0], sizes = [16, 11], strides = [1, 1]} : vector<32x11xf32> to vector<16x11xf32>
    %111 = vector.extract_strided_slice %109 {offsets = [16, 0], sizes = [16, 11], strides = [1, 1]} : vector<32x11xf32> to vector<16x11xf32>
    %112 = tpu.concatenate %110, %111, %1 in 1 : vector<16x11xf32>, vector<16x11xf32>, vector<16x4xf32> -> vector<16x26xf32>
    %cst_66 = arith.constant dense<0.000000e+00> : vector<16x11xf32>
    %113 = tpu.matmul %112, %101, %cst_66 {dimension_numbers = #tpu.dot_dimension_numbers<[1], [0], [0], [1], [0, 0, 1, 1], [], []>} : vector<16x26xf32>, vector<26x11xf32>, vector<16x11xf32> -> vector<16x11xf32>
    %114 = vector.broadcast %105 : vector<1x11xf32> to vector<16x11xf32>
    %115 = arith.addf %113, %114 : vector<16x11xf32>
    %cst_67 = arith.constant 0.000000e+00 : f32
    %116 = vector.broadcast %cst_67 : f32 to vector<16x11xf32>
    %117 = arith.maximumf %115, %116 : vector<16x11xf32>
    %cst_68 = arith.constant dense<0.000000e+00> : vector<16x11xf32>
    %118 = tpu.matmul %117, %102, %cst_68 {dimension_numbers = #tpu.dot_dimension_numbers<[1], [0], [0], [1], [0, 0, 1, 1], [], []>} : vector<16x11xf32>, vector<11x11xf32>, vector<16x11xf32> -> vector<16x11xf32>
    %119 = vector.broadcast %106 : vector<1x11xf32> to vector<16x11xf32>
    %120 = arith.addf %118, %119 : vector<16x11xf32>
    %cst_69 = arith.constant 0.000000e+00 : f32
    %121 = vector.broadcast %cst_69 : f32 to vector<16x11xf32>
    %122 = arith.maximumf %120, %121 : vector<16x11xf32>
    %cst_70 = arith.constant dense<0.000000e+00> : vector<8x11xf32>
    %123 = tpu.matmul %14, %122, %cst_70 {dimension_numbers = #tpu.dot_dimension_numbers<[1], [0], [0], [1], [0, 0, 1, 1], [], []>} : vector<8x16xf32>, vector<16x11xf32>, vector<8x11xf32> -> vector<8x11xf32>
    %124 = tpu.concatenate %100, %123 in 1 : vector<8x11xf32>, vector<8x11xf32> -> vector<8x22xf32>
    %cst_71 = arith.constant dense<0.000000e+00> : vector<8x11xf32>
    %125 = tpu.matmul %124, %103, %cst_71 {dimension_numbers = #tpu.dot_dimension_numbers<[1], [0], [0], [1], [0, 0, 1, 1], [], []>} : vector<8x22xf32>, vector<22x11xf32>, vector<8x11xf32> -> vector<8x11xf32>
    %126 = vector.broadcast %107 : vector<1x11xf32> to vector<8x11xf32>
    %127 = arith.addf %125, %126 : vector<8x11xf32>
    %cst_72 = arith.constant 0.000000e+00 : f32
    %128 = vector.broadcast %cst_72 : f32 to vector<8x11xf32>
    %129 = arith.maximumf %127, %128 : vector<8x11xf32>
    %cst_73 = arith.constant dense<0.000000e+00> : vector<8x11xf32>
    %130 = tpu.matmul %129, %104, %cst_73 {dimension_numbers = #tpu.dot_dimension_numbers<[1], [0], [0], [1], [0, 0, 1, 1], [], []>} : vector<8x11xf32>, vector<11x11xf32>, vector<8x11xf32> -> vector<8x11xf32>
    %131 = vector.broadcast %108 : vector<1x11xf32> to vector<8x11xf32>
    %132 = arith.addf %130, %131 : vector<8x11xf32>
    %cst_74 = arith.constant 0.000000e+00 : f32
    %133 = vector.broadcast %cst_74 : f32 to vector<8x11xf32>
    %134 = arith.maximumf %132, %133 : vector<8x11xf32>
    %135 = arith.addf %100, %134 : vector<8x11xf32>
    %c112 = arith.constant 112 : index
    %c0_75 = arith.constant 0 : index
    %136 = vector.load %arg2[%c112, %c0_75] : memref<144x128xf32, #tpu.memory_space<vmem>>, vector<26x11xf32>
    %c112_76 = arith.constant 112 : index
    %c11_77 = arith.constant 11 : index
    %137 = vector.load %arg2[%c112_76, %c11_77] : memref<144x128xf32, #tpu.memory_space<vmem>>, vector<11x11xf32>
    %c112_78 = arith.constant 112 : index
    %c22_79 = arith.constant 22 : index
    %138 = vector.load %arg2[%c112_78, %c22_79] : memref<144x128xf32, #tpu.memory_space<vmem>>, vector<22x11xf32>
    %c112_80 = arith.constant 112 : index
    %c33_81 = arith.constant 33 : index
    %139 = vector.load %arg2[%c112_80, %c33_81] : memref<144x128xf32, #tpu.memory_space<vmem>>, vector<11x11xf32>
    %c112_82 = arith.constant 112 : index
    %c44_83 = arith.constant 44 : index
    %140 = vector.load %arg2[%c112_82, %c44_83] : memref<144x128xf32, #tpu.memory_space<vmem>>, vector<1x11xf32>
    %c113 = arith.constant 113 : index
    %c44_84 = arith.constant 44 : index
    %141 = vector.load %arg2[%c113, %c44_84] : memref<144x128xf32, #tpu.memory_space<vmem>>, vector<1x11xf32>
    %c114 = arith.constant 114 : index
    %c44_85 = arith.constant 44 : index
    %142 = vector.load %arg2[%c114, %c44_85] : memref<144x128xf32, #tpu.memory_space<vmem>>, vector<1x11xf32>
    %c115 = arith.constant 115 : index
    %c44_86 = arith.constant 44 : index
    %143 = vector.load %arg2[%c115, %c44_86] : memref<144x128xf32, #tpu.memory_space<vmem>>, vector<1x11xf32>
    %cst_87 = arith.constant dense<0.000000e+00> : vector<32x11xf32>
    %144 = tpu.matmul %9, %135, %cst_87 {dimension_numbers = #tpu.dot_dimension_numbers<[1], [0], [0], [1], [0, 0, 1, 1], [], []>} : vector<32x8xf32>, vector<8x11xf32>, vector<32x11xf32> -> vector<32x11xf32>
    %145 = vector.extract_strided_slice %144 {offsets = [0, 0], sizes = [16, 11], strides = [1, 1]} : vector<32x11xf32> to vector<16x11xf32>
    %146 = vector.extract_strided_slice %144 {offsets = [16, 0], sizes = [16, 11], strides = [1, 1]} : vector<32x11xf32> to vector<16x11xf32>
    %147 = tpu.concatenate %145, %146, %1 in 1 : vector<16x11xf32>, vector<16x11xf32>, vector<16x4xf32> -> vector<16x26xf32>
    %cst_88 = arith.constant dense<0.000000e+00> : vector<16x11xf32>
    %148 = tpu.matmul %147, %136, %cst_88 {dimension_numbers = #tpu.dot_dimension_numbers<[1], [0], [0], [1], [0, 0, 1, 1], [], []>} : vector<16x26xf32>, vector<26x11xf32>, vector<16x11xf32> -> vector<16x11xf32>
    %149 = vector.broadcast %140 : vector<1x11xf32> to vector<16x11xf32>
    %150 = arith.addf %148, %149 : vector<16x11xf32>
    %cst_89 = arith.constant 0.000000e+00 : f32
    %151 = vector.broadcast %cst_89 : f32 to vector<16x11xf32>
    %152 = arith.maximumf %150, %151 : vector<16x11xf32>
    %cst_90 = arith.constant dense<0.000000e+00> : vector<16x11xf32>
    %153 = tpu.matmul %152, %137, %cst_90 {dimension_numbers = #tpu.dot_dimension_numbers<[1], [0], [0], [1], [0, 0, 1, 1], [], []>} : vector<16x11xf32>, vector<11x11xf32>, vector<16x11xf32> -> vector<16x11xf32>
    %154 = vector.broadcast %141 : vector<1x11xf32> to vector<16x11xf32>
    %155 = arith.addf %153, %154 : vector<16x11xf32>
    %cst_91 = arith.constant 0.000000e+00 : f32
    %156 = vector.broadcast %cst_91 : f32 to vector<16x11xf32>
    %157 = arith.maximumf %155, %156 : vector<16x11xf32>
    %cst_92 = arith.constant dense<0.000000e+00> : vector<8x11xf32>
    %158 = tpu.matmul %14, %157, %cst_92 {dimension_numbers = #tpu.dot_dimension_numbers<[1], [0], [0], [1], [0, 0, 1, 1], [], []>} : vector<8x16xf32>, vector<16x11xf32>, vector<8x11xf32> -> vector<8x11xf32>
    %159 = tpu.concatenate %135, %158 in 1 : vector<8x11xf32>, vector<8x11xf32> -> vector<8x22xf32>
    %cst_93 = arith.constant dense<0.000000e+00> : vector<8x11xf32>
    %160 = tpu.matmul %159, %138, %cst_93 {dimension_numbers = #tpu.dot_dimension_numbers<[1], [0], [0], [1], [0, 0, 1, 1], [], []>} : vector<8x22xf32>, vector<22x11xf32>, vector<8x11xf32> -> vector<8x11xf32>
    %161 = vector.broadcast %142 : vector<1x11xf32> to vector<8x11xf32>
    %162 = arith.addf %160, %161 : vector<8x11xf32>
    %cst_94 = arith.constant 0.000000e+00 : f32
    %163 = vector.broadcast %cst_94 : f32 to vector<8x11xf32>
    %164 = arith.maximumf %162, %163 : vector<8x11xf32>
    %cst_95 = arith.constant dense<0.000000e+00> : vector<8x11xf32>
    %165 = tpu.matmul %164, %139, %cst_95 {dimension_numbers = #tpu.dot_dimension_numbers<[1], [0], [0], [1], [0, 0, 1, 1], [], []>} : vector<8x11xf32>, vector<11x11xf32>, vector<8x11xf32> -> vector<8x11xf32>
    %166 = vector.broadcast %143 : vector<1x11xf32> to vector<8x11xf32>
    %167 = arith.addf %165, %166 : vector<8x11xf32>
    %cst_96 = arith.constant 0.000000e+00 : f32
    %168 = vector.broadcast %cst_96 : f32 to vector<8x11xf32>
    %169 = arith.maximumf %167, %168 : vector<8x11xf32>
    %170 = arith.addf %135, %169 : vector<8x11xf32>
    %cst_97 = arith.constant dense<0.000000e+00> : vector<2x11xf32>
    %171 = tpu.matmul %25, %170, %cst_97 {dimension_numbers = #tpu.dot_dimension_numbers<[1], [0], [0], [1], [0, 0, 1, 1], [], []>} : vector<2x8xf32>, vector<8x11xf32>, vector<2x11xf32> -> vector<2x11xf32>
    %c0_98 = arith.constant 0 : index
    %c0_99 = arith.constant 0 : index
    %172 = vector.load %arg3[%c0_98, %c0_99] : memref<2x11xf32, #tpu.memory_space<vmem>>, vector<2x11xf32>
    tpu.vector_store %arg3[%c0_98, %c0_99], %171 {strides = array<i32>} : memref<2x11xf32, #tpu.memory_space<vmem>>, vector<2x11xf32>,
    return
  }
}

</mosaic_0001>

<bundles_post_ra>
// kernel: mpnn_pallas.1
= control target key start
LH: loop header
LB: loop body
LE: loop exit
PB: predicated region body
PF: predicated region fallthrough
CT: control target
= control target key end

     0   :  { %vm95_vm0 = vcmask 1045504   ;;  %v1256_v3 = vmov 0   ;;  %vm91_vm1 = vcmask 113664   ;;  %s1257_s24 = smov 117   ;;  %v23_v10 = vlaneseq  ;;  %s1258_s4 = smov 22   ;;  %s1668_s2 = inlined_call_operand.vmem [shape: f32[144,128], index: 2, kind: input, shape index: {}]   ;;  %s1669_s1 = inlined_call_operand.vmem [shape: f32[24,14], index: 1, kind: input, shape index: {}]   ;;  %s1670_s0 = inlined_call_operand.vmem [shape: s32[32,17], index: 0, kind: input, shape index: {}]   ;;  %s1671_s3 = inlined_call_operand.vmem [shape: f32[2,11], index: 3, kind: output, shape index: {}]  }
   0x1   :  { %v84_v0 = vld [vmem:[%s1668_s2 + $0x8] sm:$0x3f]  ;;  %v83_v1 = vld [vmem:[%s1668_s2] sm:$0xff]  ;;  %1213 = vset.pattern.permute.xlu1 %v1256_v3  ;;  %1212 = vset.pattern.permute.xlu0 %v1256_v3  ;;  %v20_v6 = vld [vmem:[%s1670_s0 + $0x18] sm:$0xff]  ;;  %v1259_v16 = vmov 0.0   ;;  %vm129_vm3 = vcmask 64512  }
   0x2   :  { %v14_v2 = vld [vmem:[%s1669_s1] sm:$0xff]  ;;  %1140 = vmatpush.msk.msra.mxu0 %vm95_vm0, %v84_v0  ;;  %v18_v5 = vld [vmem:[%s1670_s0 + $0x8] sm:$0xff]  ;;  %1214 = vset.pattern.permute.xlu2 %v1256_v3  ;;  %v19_v7 = vld [vmem:[%s1670_s0 + $0x10] sm:$0xff]  ;;  %v24_v11 = vand.u32 127, %v23_v10  ;;  %vm205_vm7 = vcmask 1041408   ;;  %s1260_s14 = smov 11  }
   0x3   :  { %v1235_v4 = vld [vmem:[%s1668_s2] ss:$0 sm:$0xff]  ;;  %29 = vperm.xlu1 %1213, %v18_v5   ;;  %35 = vperm.xlu2 %1214, %v20_v6   ;;  %v15_v13 = vld [vmem:[%s1669_s1 + $0x8] sm:$0xff]  ;;  %v16_v24 = vld [vmem:[%s1669_s1 + $0x10] sm:$0xff]  ;;  %s1261_s19 = smov 84   ;;  %vm187_vm8 = vcmask 89088  }
   0x4   :  { %114 = vmatpush.msra.mxu0 %v83_v1  ;;  %88 = vrot.lane.b32.xlu0 %v1235_v4, %s1257_s24  ;;  %v17_v8 = vld [vmem:[%s1670_s0] sm:$0xff]  ;;  %v122_v25 = vld [vmem:[%s1668_s2 + $0x28] sm:$0x3]  ;;  %v1350_v27 = vld [vmem:[%s1668_s2 + $0x10] sm:$0xff]  ;;  %vm190_vm9 = vcmask 179200   ;;  %vm198_vm10 = vcmask 211968  }
   0x5   :  { %1141 = vmatmul.msk.f32.vlgmr.msra.gmra.mxu0 %vm91_vm1, %v14_v2  ;;  %v121_v26 = vld [vmem:[%s1668_s2 + $0x20] sm:$0xff]  ;;  %1146 = vmatpush.msk.msra.mxu2 %vm205_vm7, %v122_v25  ;;  %v120_v28 = vld [vmem:[%s1668_s2 + $0x18] sm:$0xff]  ;;  %v1236_v33 = vld [vmem:[%s1668_s2 + $0x10] ss:$0 sm:$0xff]  ;;  %vm252_vm11 = vcmask 1042432   ;;  %v1386_v46 = vshrl.u32 %v23_v10, 7 }
   0x6   :  { %v123_v34 = vld [vmem:[%s1668_s2 + $0x18] sm:$0x7]  ;;  %v1237_v45 = vld [vmem:[%s1668_s2 + $0x11] ss:$0 sm:$0xff]  ;;  %v1238_v47 = vld [vmem:[%s1670_s0] ss:$0 sm:$0xff]  ;;  %v1215_v56 = vpack.i.bf16 %v1350_v27, %v120_v28 }
   0x7   :  { %222 = vmatpush.msra.mxu2 %v121_v26  ;;  %vm52_vm12 = vcmp.eq.s32.totalorder %v1386_v46, %v1238_v47  ;;  %s1262_s25 = smov 127   ;;  %s1263_s26 = smov 106   ;;  %v124_v57 = vld [vmem:[%s1668_s2 + $0x20] sm:$0x3f]  ;;  %vm283_vm13 = vcmask 130048   ;;  %vm63_vm15 = vcmask 58368  }
   0x8   :  { %v1138_v48 = vsel %vm52_vm12, 1.0, %v1259_v16  ;;  %s1264_s29 = smov 95  }
   0x9   :  { %223 = vmatpush.msra.mxu2 %v120_v28 }
   0xb   :  { %32 = vperm.xlu1 %1213, %v19_v7   ;;  %224 = vmatpush.msra.mxu2 %v1350_v27  ;;  %v1239_v7 = vld [vmem:[%s1668_s2 + $0x12] ss:$0 sm:$0xff] }
   0xc   :  { %26 = vperm.xlu0 %1212, %v17_v8  }
  0x13   :  { %181 = vrot.lane.b32.xlu1 %v15_v13, %s1258_s4 }
  0x14   :  { %183 = vrot.lane.b32.xlu0 %v16_v24, %s1258_s4 }
  0x1b   :  { %195 = vrot.lane.b32.xlu1 %v1236_v33, %s1261_s19  ;;  %v389_v33 = vld [vmem:[%s1668_s2 + $0x30] sm:$0xff] }
  0x1c   :  { %237 = vrot.lane.b32.xlu0 %v1350_v27, %s1257_s24 }
  0x23   :  { %243 = vrot.lane.b32.xlu1 %v1237_v45, %s1261_s19 }
  0x24   :  { %318 = vrot.lane.b32.xlu0 %v124_v57, %s1263_s26  ;;  %v394_v57 = vld [vmem:[%s1668_s2 + $0x40] sm:$0x3f] }
  0x2b   :  { %1216 = vrot.lane.b32.xlu1 %v1215_v56, %s1263_s26 }
  0x2c   :  { %323 = vrot.lane.b32.xlu0 %v1239_v7, %s1261_s19  ;;  %v1243_v7 = vld [vmem:[%s1668_s2 + $0x32] ss:$0 sm:$0xff] }
  0x33   :  { %355 = vrot.lane.b32.xlu1 %v123_v34, %s1264_s29 }
  0x5d   :  { %v36_v22 = vpop.permute.xlu2 %35 }
  0x5e   :  { %vm40_vm6 = vcmp.eq.s32.totalorder %v24_v11, %v36_v22 }
  0x5f   :  { %v1334_v23 = vsel %vm40_vm6, 1.0, %v1259_v16 }
  0x75   :  { %v30_v18 = vpop.permute.xlu1 %29 }
  0x76   :  { %v89_v9 = vpop.permute.xlu0 %88  ;;  %vm38_vm4 = vcmp.eq.s32.totalorder %v24_v11, %v30_v18 }
  0x77   :  { %v1324_v19 = vsel %vm38_vm4, 1.0, %v1259_v16 }
  0x7d   :  { %v33_v20 = vpop.permute.xlu1 %32 }
  0x7e   :  { %v27_v12 = vpop.permute.xlu0 %26  ;;  %vm39_vm5 = vcmp.eq.s32.totalorder %v24_v11, %v33_v20 }
  0x7f   :  { %vm37_vm2 = vcmp.eq.s32.totalorder %v24_v11, %v27_v12  ;;  %v1329_v21 = vsel %vm39_vm5, 1.0, %v1259_v16  ;;  %v1240_v12 = vld [vmem:[%s1668_s2 + $0x13] ss:$0 sm:$0xff]  ;;  %vm1128_vm5 = vcmask 82944  }
  0x80   :  { %v1318_v17 = vsel %vm37_vm2, 1.0, %v1259_v16  ;;  %359 = vrot.lane.b32.xlu0 %v1240_v12, %s1261_s19  ;;  %v1244_v12 = vld [vmem:[%s1668_s2 + $0x33] ss:$0 sm:$0xff] }
  0x82   :  { %v116_v14 = vpop.f32.mrf.mxu0 }
  0x83   :  { %v1315_v15 = vadd.f32 %v116_v14, %v89_v9 }
  0x85   :  { %157 = vmatpush.msra.mxu1 %v1315_v15  ;;  %v1369_v35 = vpop.permute.xlu1 %181 }
  0x86   :  { %1142 = vmatmul.msk.f32.vlgmr.msra.gmra.mxu1 %vm129_vm3, %v1318_v17  ;;  %v1375_v39 = vpop.permute.xlu0 %183 }
  0x8d   :  { %v196_v49 = vpop.permute.xlu1 %195 }
  0x8e   :  { %1143 = vmatmul.msk.f32.gmra.mxu1 %vm129_vm3, %v1324_v19  ;;  %v238_v44 = vpop.permute.xlu0 %237 }
  0x95   :  { %v244_v59 = vpop.permute.xlu1 %243 }
  0x96   :  { %1144 = vmatmul.msk.f32.gmra.mxu1 %vm129_vm3, %v1329_v21  ;;  %v319_v3 = vpop.permute.xlu0 %318 }
  0x9d   :  { %v1217_v2 = vpop.permute.xlu1 %1216 }
  0x9e   :  { %1145 = vmatmul.msk.f32.gmra.mxu1 %vm129_vm3, %v1334_v23  ;;  %v1219_v4 = vunpack.i.h.bf16 %v1217_v2  ;;  %v1218_v5 = vunpack.i.l.bf16 %v1217_v2  ;;  %v324_v13 = vpop.permute.xlu0 %323 }
  0xa5   :  { %v356_v10 = vpop.permute.xlu1 %355 }
  0xf2   :  { %v360_v22 = vpop.permute.xlu0 %359 }
 0x103   :  { %v159_v29 = vpop.f32.mrf.mxu1 }
 0x10b   :  { %v162_v30 = vpop.f32.mrf.mxu1 }
 0x113   :  { %v165_v31 = vpop.f32.mrf.mxu1 }
 0x114   :  { %173 = vrot.lane.b32.xlu2 %v165_v31, %s1260_s14  ;;  %v392_v31 = vld [vmem:[%s1668_s2 + $0x48] sm:$0x3] }
 0x11b   :  { %v168_v32 = vpop.f32.mrf.mxu1 }
 0x11c   :  { %175 = vrot.lane.b32.xlu2 %v168_v32, %s1260_s14  ;;  %v391_v32 = vld [vmem:[%s1668_s2 + $0x40] sm:$0xff] }
 0x124   :  { %239 = vrot.lane.b32.xlu2 %v123_v34, %s1257_s24  ;;  %v390_v34 = vld [vmem:[%s1668_s2 + $0x38] sm:$0xff] }
 0x12c   :  { %281 = vrot.lane.b32.xlu2 %v1138_v48, %s1262_s25 }
 0x16e   :  { %v174_v36 = vpop.permute.xlu2 %173 }
 0x16f   :  { %v188_v37 = vsel %vm187_vm8, %v159_v29, %v174_v36  ;;  %v1220_v36 = vpack.i.bf16 %v389_v33, %v390_v34 }
 0x170   :  { %v191_v38 = vsel %vm190_vm9, %v188_v37, %v1369_v35  ;;  %v1241_v37 = vld [vmem:[%s1668_s2 + $0x30] ss:$0 sm:$0xff] }
 0x171   :  { %1147 = vmatmul.msk.f32.vlgmr.msra.gmra.mxu2 %vm198_vm10, %v191_v38  ;;  %v393_v38 = vld [vmem:[%s1668_s2 + $0x38] sm:$0x7]  ;;  %442 = vrot.lane.b32.xlu0 %v1241_v37, %s1261_s19  ;;  %v1245_v37 = vld [vmem:[%s1668_s2 + $0x50] ss:$0 sm:$0xff] }
 0x176   :  { %v176_v40 = vpop.permute.xlu2 %175 }
 0x177   :  { %v189_v41 = vsel %vm187_vm8, %v162_v30, %v176_v40 }
 0x178   :  { %v192_v42 = vsel %vm190_vm9, %v189_v41, %v1375_v39 }
 0x179   :  { %1148 = vmatmul.msk.f32.gmra.mxu2 %vm198_vm10, %v192_v42 }
 0x17e   :  { %v240_v43 = vpop.permute.xlu2 %239 }
 0x17f   :  { %1149 = vmatpush.msk.msra.mxu3 %vm252_vm11, %v240_v43 }
 0x181   :  { %270 = vmatpush.msra.mxu3 %v238_v44 }
 0x183   :  { %1155 = vmatpush.msk.msrb.mxu3 %vm252_vm11, %v356_v10 }
 0x186   :  { %v1403_v1 = vpop.permute.xlu2 %281 }
 0x1f4   :  { %v226_v50 = vpop.f32.mrf.mxu2 }
 0x1f5   :  { %v227_v51 = vadd.f32 %v226_v50, %v196_v49  ;;  %v443_v50 = vpop.permute.xlu0 %442 }
 0x1f7   :  { %v232_v52 = vmax.f32 %v227_v51, 0.0 }
 0x1f9   :  { %1150 = vmatmul.msk.f32.vlgmr.msra.gmra.mxu3 %vm187_vm8, %v232_v52 }
 0x1fc   :  { %v229_v53 = vpop.f32.mrf.mxu2 }
 0x1fd   :  { %v230_v54 = vadd.f32 %v229_v53, %v196_v49  ;;  %v1242_v49 = vld [vmem:[%s1668_s2 + $0x31] ss:$0 sm:$0xff] }
 0x1fe   :  { %488 = vrot.lane.b32.xlu0 %v1242_v49, %s1261_s19  ;;  %v1246_v49 = vld [vmem:[%s1668_s2 + $0x51] ss:$0 sm:$0xff] }
 0x1ff   :  { %v233_v55 = vmax.f32 %v230_v54, 0.0 }
 0x201   :  { %1151 = vmatmul.msk.f32.gmra.mxu3 %vm187_vm8, %v233_v55 }
 0x27c   :  { %v272_v58 = vpop.f32.mrf.mxu3 }
 0x27d   :  { %v273_v61 = vadd.f32 %v272_v58, %v244_v59 }
 0x27f   :  { %v278_v0 = vmax.f32 %v273_v61, 0.0 }
 0x284   :  { %v275_v60 = vpop.f32.mrf.mxu3 }
 0x285   :  { %v276_v62 = vadd.f32 %v275_v60, %v244_v59  ;;  %v489_v59 = vpop.permute.xlu0 %488 }
 0x287   :  { %v279_v63 = vmax.f32 %v276_v62, 0.0 }
 0x289   :  { %300 = vmatpush.msrb.mxu0 %v279_v63 }
 0x28b   :  { %301 = vmatpush.msrb.mxu0 %v278_v0 }
 0x28c   :  { %1152 = vmatmul.msk.f32.vlgmr.msrb.gmra.mxu0 %vm283_vm13, %v1403_v1 }
 0x28d   :  { %1153 = vmatpush.msk.msra.mxu0 %vm95_vm0, %v319_v3 }
 0x28f   :  { %345 = vmatpush.msra.mxu0 %v1218_v5 }
 0x291   :  { %346 = vmatpush.msra.mxu0 %v1219_v4 }
 0x293   :  { %1161 = vmatpush.msk.msrb.mxu0 %vm205_vm7, %v392_v31 }
 0x295   :  { %467 = vmatpush.msrb.mxu0 %v391_v32 }
 0x297   :  { %468 = vmatpush.msrb.mxu0 %v390_v34 }
 0x299   :  { %469 = vmatpush.msrb.mxu0 %v389_v33 }
 0x309   :  { %v303_v6 = vpop.f32.mrf.mxu0 }
 0x30a   :  { %307 = vrot.lane.b32.xlu2 %v303_v6, %s1260_s14 }
 0x312   :  { %353 = vrot.lane.b32.xlu2 %v1350_v27, %s1264_s29 }
 0x364   :  { %v308_v8 = vpop.permute.xlu2 %307 }
 0x365   :  { %v310_v9 = vsel %vm187_vm8, %v1315_v15, %v308_v8 }
 0x366   :  { %1154 = vmatmul.msk.f32.vlgmr.msra.gmra.mxu0 %vm190_vm9, %v310_v9 }
 0x36c   :  { %v354_v11 = vpop.permute.xlu2 %353 }
 0x36d   :  { %382 = vmatpush.msrb.mxu3 %v354_v11 }
 0x3e3   :  { %v348_v14 = vpop.f32.mrf.mxu0 }
 0x3e4   :  { %v349_v18 = vadd.f32 %v348_v14, %v324_v13 }
 0x3e6   :  { %v351_v20 = vmax.f32 %v349_v18, 0.0 }
 0x3e8   :  { %1156 = vmatmul.msk.f32.vlgmr.msrb.gmra.mxu3 %vm187_vm8, %v351_v20 }
 0x46b   :  { %v384_v24 = vpop.f32.mrf.mxu3 }
 0x46c   :  { %v385_v25 = vadd.f32 %v384_v24, %v360_v22 }
 0x46e   :  { %v387_v26 = vmax.f32 %v385_v25, 0.0 }
 0x470   :  { %v1426_v27 = vadd.f32 %v387_v26, %v1315_v15 }
 0x472   :  { %414 = vmatpush.msrb.mxu2 %v1426_v27 }
 0x473   :  { %1157 = vmatmul.msk.f32.vlgmr.msrb.gmra.mxu2 %vm129_vm3, %v1318_v17 }
 0x47b   :  { %1158 = vmatmul.msk.f32.gmra.mxu2 %vm129_vm3, %v1324_v19 }
 0x483   :  { %1159 = vmatmul.msk.f32.gmra.mxu2 %vm129_vm3, %v1329_v21 }
 0x48b   :  { %1160 = vmatmul.msk.f32.gmra.mxu2 %vm129_vm3, %v1334_v23 }
 0x4f6   :  { %v416_v28 = vpop.f32.mrf.mxu2 }
 0x4fe   :  { %v419_v29 = vpop.f32.mrf.mxu2 }
 0x506   :  { %v422_v30 = vpop.f32.mrf.mxu2 }
 0x507   :  { %430 = vrot.lane.b32.xlu1 %v422_v30, %s1260_s14  ;;  %v628_v30 = vld [vmem:[%s1668_s2 + $0x58] sm:$0xff] }
 0x50e   :  { %v425_v15 = vpop.f32.mrf.mxu2 }
 0x50f   :  { %432 = vrot.lane.b32.xlu2 %v425_v15, %s1260_s14  ;;  %484 = vrot.lane.b32.xlu1 %v393_v38, %s1257_s24  ;;  %v627_v15 = vld [vmem:[%s1668_s2 + $0x50] sm:$0xff] }
 0x517   :  { %482 = vrot.lane.b32.xlu2 %v389_v33, %s1257_s24  ;;  %556 = vrot.lane.b32.xlu1 %v394_v57, %s1263_s26 }
 0x51f   :  { %1221 = vrot.lane.b32.xlu2 %v1220_v36, %s1263_s26  ;;  %561 = vrot.lane.b32.xlu1 %v1243_v7, %s1261_s19  ;;  %v1225_v36 = vpack.i.bf16 %v627_v15, %v628_v30  ;;  %v1247_v7 = vld [vmem:[%s1668_s2 + $0x52] ss:$0 sm:$0xff] }
 0x527   :  { %593 = vrot.lane.b32.xlu2 %v393_v38, %s1264_s29  ;;  %597 = vrot.lane.b32.xlu1 %v1244_v12, %s1261_s19  ;;  %v1248_v12 = vld [vmem:[%s1668_s2 + $0x53] ss:$0 sm:$0xff] }
 0x52f   :  { %680 = vrot.lane.b32.xlu1 %v1245_v37, %s1261_s19 }
 0x537   :  { %726 = vrot.lane.b32.xlu1 %v1246_v49, %s1261_s19 }
 0x569   :  { %v433_v43 = vpop.permute.xlu2 %432 }
 0x56a   :  { %v437_v44 = vsel %vm187_vm8, %v419_v29, %v433_v43  ;;  %v630_v29 = vld [vmem:[%s1668_s2 + $0x68] sm:$0x3] }
 0x56b   :  { %v439_v45 = vsel %vm190_vm9, %v437_v44, %v1375_v39 }
 0x571   :  { %v483_v48 = vpop.permute.xlu2 %482 }
 0x579   :  { %v431_v40 = vpop.permute.xlu1 %430  ;;  %v1222_v3 = vpop.permute.xlu2 %1221 }
 0x57a   :  { %v436_v41 = vsel %vm187_vm8, %v416_v28, %v431_v40  ;;  %v1224_v4 = vunpack.i.h.bf16 %v1222_v3  ;;  %v1223_v5 = vunpack.i.l.bf16 %v1222_v3 }
 0x57b   :  { %v438_v42 = vsel %vm190_vm9, %v436_v41, %v1369_v35 }
 0x57c   :  { %1162 = vmatmul.msk.f32.vlgmr.msrb.gmra.mxu0 %vm198_vm10, %v438_v42  ;;  %v631_v42 = vld [vmem:[%s1668_s2 + $0x58] sm:$0x7] }
 0x581   :  { %v485_v47 = vpop.permute.xlu1 %484  ;;  %v594_v10 = vpop.permute.xlu2 %593 }
 0x582   :  { %1164 = vmatpush.msk.msra.mxu3 %vm252_vm11, %v485_v47  ;;  %1170 = vmatpush.msk.msra.mxu0 %vm252_vm11, %v594_v10 }
 0x584   :  { %1163 = vmatmul.msk.f32.gmra.mxu0 %vm198_vm10, %v439_v45  ;;  %514 = vmatpush.msra.mxu3 %v483_v48 }
 0x589   :  { %v557_v2 = vpop.permute.xlu1 %556 }
 0x591   :  { %v562_v13 = vpop.permute.xlu1 %561 }
 0x599   :  { %v598_v22 = vpop.permute.xlu1 %597 }
 0x5f9   :  { %v471_v51 = vpop.f32.mrf.mxu0 }
 0x5fa   :  { %v472_v52 = vadd.f32 %v471_v51, %v443_v50 }
 0x5fc   :  { %v477_v53 = vmax.f32 %v472_v52, 0.0 }
 0x5fe   :  { %1165 = vmatmul.msk.f32.vlgmr.msra.gmra.mxu3 %vm187_vm8, %v477_v53 }
 0x601   :  { %v474_v54 = vpop.f32.mrf.mxu0 }
 0x602   :  { %v475_v55 = vadd.f32 %v474_v54, %v443_v50  ;;  %v681_v50 = vpop.permute.xlu1 %680 }
 0x604   :  { %v478_v56 = vmax.f32 %v475_v55, 0.0 }
 0x606   :  { %1166 = vmatmul.msk.f32.gmra.mxu3 %vm187_vm8, %v478_v56 }
 0x681   :  { %v516_v58 = vpop.f32.mrf.mxu3 }
 0x682   :  { %v517_v61 = vadd.f32 %v516_v58, %v489_v59  ;;  %v727_v58 = vpop.permute.xlu1 %726 }
 0x684   :  { %v522_v0 = vmax.f32 %v517_v61, 0.0 }
 0x689   :  { %v519_v60 = vpop.f32.mrf.mxu3 }
 0x68a   :  { %v520_v62 = vadd.f32 %v519_v60, %v489_v59 }
 0x68c   :  { %v523_v63 = vmax.f32 %v520_v62, 0.0 }
 0x68e   :  { %538 = vmatpush.msrb.mxu1 %v523_v63 }
 0x690   :  { %539 = vmatpush.msrb.mxu1 %v522_v0  ;;  %v632_v0 = vld [vmem:[%s1668_s2 + $0x60] sm:$0x3f] }
 0x691   :  { %1167 = vmatmul.msk.f32.vlgmr.msrb.gmra.mxu1 %vm283_vm13, %v1403_v1 }
 0x692   :  { %1168 = vmatpush.msk.msra.mxu1 %vm95_vm0, %v557_v2 }
 0x694   :  { %583 = vmatpush.msra.mxu1 %v1223_v5 }
 0x696   :  { %584 = vmatpush.msra.mxu1 %v1224_v4 }
 0x698   :  { %1176 = vmatpush.msk.msrb.mxu1 %vm205_vm7, %v630_v29 }
 0x70e   :  { %v541_v6 = vpop.f32.mrf.mxu1 }
 0x70f   :  { %545 = vrot.lane.b32.xlu0 %v541_v6, %s1260_s14 }
 0x717   :  { %591 = vrot.lane.b32.xlu0 %v389_v33, %s1264_s29 }
 0x781   :  { %v546_v8 = vpop.permute.xlu0 %545 }
 0x782   :  { %v548_v9 = vsel %vm187_vm8, %v1426_v27, %v546_v8 }
 0x783   :  { %1169 = vmatmul.msk.f32.vlgmr.msra.gmra.mxu1 %vm190_vm9, %v548_v9 }
 0x789   :  { %v592_v11 = vpop.permute.xlu0 %591 }
 0x78a   :  { %620 = vmatpush.msra.mxu0 %v592_v11 }
 0x800   :  { %v586_v14 = vpop.f32.mrf.mxu1 }
 0x801   :  { %v587_v18 = vadd.f32 %v586_v14, %v562_v13 }
 0x803   :  { %v589_v20 = vmax.f32 %v587_v18, 0.0 }
 0x805   :  { %1171 = vmatmul.msk.f32.vlgmr.msra.gmra.mxu0 %vm187_vm8, %v589_v20 }
 0x882   :  { %v622_v24 = vpop.f32.mrf.mxu0 }
 0x883   :  { %v623_v25 = vadd.f32 %v622_v24, %v598_v22 }
 0x885   :  { %v625_v26 = vmax.f32 %v623_v25, 0.0 }
 0x887   :  { %v1501_v28 = vadd.f32 %v625_v26, %v1426_v27  ;;  %v629_v27 = vld [vmem:[%s1668_s2 + $0x60] sm:$0xff] }
 0x888   :  { %705 = vmatpush.msrb.mxu1 %v629_v27  ;;  %v868_v27 = vld [vmem:[%s1668_s2 + $0x88] sm:$0x3] }
 0x889   :  { %652 = vmatpush.msrb.mxu3 %v1501_v28 }
 0x88a   :  { %1172 = vmatmul.msk.f32.vlgmr.msrb.gmra.mxu3 %vm129_vm3, %v1318_v17  ;;  %706 = vmatpush.msrb.mxu1 %v628_v30 }
 0x88c   :  { %707 = vmatpush.msrb.mxu1 %v627_v15 }
 0x892   :  { %1173 = vmatmul.msk.f32.gmra.mxu3 %vm129_vm3, %v1324_v19 }
 0x89a   :  { %1174 = vmatmul.msk.f32.gmra.mxu3 %vm129_vm3, %v1329_v21 }
 0x8a2   :  { %1175 = vmatmul.msk.f32.gmra.mxu3 %vm129_vm3, %v1334_v23 }
 0x90d   :  { %v654_v31 = vpop.f32.mrf.mxu3 }
 0x915   :  { %v657_v32 = vpop.f32.mrf.mxu3 }
 0x91d   :  { %v660_v33 = vpop.f32.mrf.mxu3 }
 0x91e   :  { %668 = vrot.lane.b32.xlu2 %v660_v33, %s1260_s14  ;;  %v1249_v33 = vld [vmem:[%s1668_s2 + $0x70] ss:$0 sm:$0xff] }
 0x925   :  { %v663_v34 = vpop.f32.mrf.mxu3 }
 0x926   :  { %670 = vrot.lane.b32.xlu0 %v663_v34, %s1260_s14  ;;  %722 = vrot.lane.b32.xlu2 %v631_v42, %s1257_s24 }
 0x92e   :  { %720 = vrot.lane.b32.xlu0 %v627_v15, %s1257_s24  ;;  %794 = vrot.lane.b32.xlu2 %v632_v0, %s1263_s26 }
 0x936   :  { %1226 = vrot.lane.b32.xlu0 %v1225_v36, %s1263_s26  ;;  %799 = vrot.lane.b32.xlu2 %v1247_v7, %s1261_s19 }
 0x93e   :  { %831 = vrot.lane.b32.xlu0 %v631_v42, %s1264_s29  ;;  %835 = vrot.lane.b32.xlu2 %v1248_v12, %s1261_s19 }
 0x946   :  { %918 = vrot.lane.b32.xlu2 %v1249_v33, %s1261_s19 }
 0x978   :  { %v669_v38 = vpop.permute.xlu2 %668 }
 0x979   :  { %v674_v40 = vsel %vm187_vm8, %v654_v31, %v669_v38 }
 0x97a   :  { %v676_v41 = vsel %vm190_vm9, %v674_v40, %v1369_v35 }
 0x97b   :  { %1177 = vmatmul.msk.f32.vlgmr.msrb.gmra.mxu1 %vm198_vm10, %v676_v41 }
 0x980   :  { %v723_v47 = vpop.permute.xlu2 %722 }
 0x981   :  { %1179 = vmatpush.msk.msrb.mxu0 %vm252_vm11, %v723_v47 }
 0x988   :  { %v795_v5 = vpop.permute.xlu2 %794 }
 0x990   :  { %v800_v13 = vpop.permute.xlu2 %799 }
 0x998   :  { %v671_v43 = vpop.permute.xlu0 %670  ;;  %v836_v22 = vpop.permute.xlu2 %835 }
 0x999   :  { %v675_v44 = vsel %vm187_vm8, %v657_v32, %v671_v43  ;;  %v869_v32 = vld [vmem:[%s1668_s2 + $0x78] sm:$0x7] }
 0x99a   :  { %v677_v45 = vsel %vm190_vm9, %v675_v44, %v1375_v39  ;;  %v1250_v44 = vld [vmem:[%s1668_s2 + $0x71] ss:$0 sm:$0xff] }
 0x99b   :  { %1178 = vmatmul.msk.f32.gmra.mxu1 %vm198_vm10, %v677_v45  ;;  %964 = vrot.lane.b32.xlu2 %v1250_v44, %s1261_s19 }
 0x9a0   :  { %v721_v48 = vpop.permute.xlu0 %720 }
 0x9a1   :  { %752 = vmatpush.msrb.mxu0 %v721_v48 }
 0x9a8   :  { %v1227_v3 = vpop.permute.xlu0 %1226 }
 0x9a9   :  { %v1228_v4 = vunpack.i.l.bf16 %v1227_v3  ;;  %v1229_v6 = vunpack.i.h.bf16 %v1227_v3 }
 0x9b0   :  { %v832_v10 = vpop.permute.xlu0 %831 }
 0x9b1   :  { %1185 = vmatpush.msk.msra.mxu1 %vm252_vm11, %v832_v10 }
 0x9f8   :  { %v709_v51 = vpop.f32.mrf.mxu1 }
 0x9f9   :  { %v710_v52 = vadd.f32 %v709_v51, %v681_v50  ;;  %v870_v51 = vld [vmem:[%s1668_s2 + $0x80] sm:$0x3f] }
 0x9fb   :  { %v715_v53 = vmax.f32 %v710_v52, 0.0 }
 0x9fd   :  { %1180 = vmatmul.msk.f32.vlgmr.msrb.gmra.mxu0 %vm187_vm8, %v715_v53 }
 0xa18   :  { %v712_v54 = vpop.f32.mrf.mxu1 }
 0xa19   :  { %v713_v55 = vadd.f32 %v712_v54, %v681_v50 }
 0xa1b   :  { %v716_v56 = vmax.f32 %v713_v55, 0.0 }
 0xa1d   :  { %1181 = vmatmul.msk.f32.gmra.mxu0 %vm187_vm8, %v716_v56 }
 0xa7a   :  { %v754_v57 = vpop.f32.mrf.mxu0 }
 0xa7b   :  { %v755_v60 = vadd.f32 %v754_v57, %v727_v58 }
 0xa7d   :  { %v760_v63 = vmax.f32 %v755_v60, 0.0  ;;  %v1252_v60 = vld [vmem:[%s1670_s0 + $0x1] ss:$0 sm:$0xff] }
 0xa7e   :  { %vm56_vm14 = vcmp.eq.s32.totalorder %v1386_v46, %v1252_v60 }
 0xa9a   :  { %v757_v59 = vpop.f32.mrf.mxu0 }
 0xa9b   :  { %v758_v61 = vadd.f32 %v757_v59, %v727_v58  ;;  %v1251_v59 = vld [vmem:[%s1668_s2 + $0x72] ss:$0 sm:$0xff] }
 0xa9d   :  { %v761_v62 = vmax.f32 %v758_v61, 0.0  ;;  %v1139_v61 = vsel %vm56_vm14, 1.0, %v1259_v16 }
 0xa9f   :  { %776 = vmatpush.msra.mxu2 %v761_v62 }
 0xaa1   :  { %777 = vmatpush.msra.mxu2 %v760_v63 }
 0xaa2   :  { %1182 = vmatmul.msk.f32.vlgmr.msra.gmra.mxu2 %vm283_vm13, %v1403_v1 }
 0xaa3   :  { %1183 = vmatpush.msk.msrb.mxu2 %vm95_vm0, %v795_v5 }
 0xaa5   :  { %821 = vmatpush.msrb.mxu2 %v1228_v4 }
 0xaa7   :  { %822 = vmatpush.msrb.mxu2 %v1229_v6 }
 0xaa9   :  { %1191 = vmatpush.msk.msra.mxu2 %vm205_vm7, %v868_v27 }
 0xb25   :  { %v779_v2 = vpop.f32.mrf.mxu2 }
 0xb26   :  { %783 = vrot.lane.b32.xlu1 %v779_v2, %s1260_s14 }
 0xb2e   :  { %829 = vrot.lane.b32.xlu1 %v627_v15, %s1264_s29 }
 0xb98   :  { %v784_v8 = vpop.permute.xlu1 %783 }
 0xb99   :  { %v786_v9 = vsel %vm187_vm8, %v1501_v28, %v784_v8 }
 0xb9a   :  { %1184 = vmatmul.msk.f32.vlgmr.msrb.gmra.mxu2 %vm190_vm9, %v786_v9 }
 0xba0   :  { %v830_v11 = vpop.permute.xlu1 %829 }
 0xba1   :  { %858 = vmatpush.msra.mxu1 %v830_v11 }
 0xc1d   :  { %v824_v14 = vpop.f32.mrf.mxu2 }
 0xc1e   :  { %v825_v18 = vadd.f32 %v824_v14, %v800_v13  ;;  %v1253_v13 = vld [vmem:[%s1668_s2 + $0x73] ss:$0 sm:$0xff] }
 0xc20   :  { %v827_v20 = vmax.f32 %v825_v18, 0.0 }
 0xc22   :  { %1186 = vmatmul.msk.f32.vlgmr.msra.gmra.mxu1 %vm187_vm8, %v827_v20 }
 0xc9f   :  { %v860_v24 = vpop.f32.mrf.mxu1 }
 0xca0   :  { %v861_v25 = vadd.f32 %v860_v24, %v836_v22 }
 0xca2   :  { %v863_v26 = vmax.f32 %v861_v25, 0.0 }
 0xca4   :  { %v1576_v29 = vadd.f32 %v863_v26, %v1501_v28  ;;  %v867_v28 = vld [vmem:[%s1668_s2 + $0x80] sm:$0xff] }
 0xca5   :  { %943 = vmatpush.msra.mxu2 %v867_v28 }
 0xca6   :  { %890 = vmatpush.msra.mxu0 %v1576_v29 }
 0xca7   :  { %1187 = vmatmul.msk.f32.vlgmr.msra.gmra.mxu0 %vm129_vm3, %v1318_v17  ;;  %v866_v17 = vld [vmem:[%s1668_s2 + $0x78] sm:$0xff] }
 0xca8   :  { %944 = vmatpush.msra.mxu2 %v866_v17 }
 0xcaf   :  { %1188 = vmatmul.msk.f32.gmra.mxu0 %vm129_vm3, %v1324_v19  ;;  %v1600_v19 = vld [vmem:[%s1668_s2 + $0x70] sm:$0xff] }
 0xcb0   :  { %945 = vmatpush.msra.mxu2 %v1600_v19  ;;  %v1230_v31 = vpack.i.bf16 %v1600_v19, %v866_v17 }
 0xcb7   :  { %1189 = vmatmul.msk.f32.gmra.mxu0 %vm129_vm3, %v1329_v21 }
 0xcbf   :  { %1190 = vmatmul.msk.f32.gmra.mxu0 %vm129_vm3, %v1334_v23 }
 0xd24   :  { %v892_v21 = vpop.f32.mrf.mxu0 }
 0xd2c   :  { %v895_v23 = vpop.f32.mrf.mxu0 }
 0xd34   :  { %v898_v30 = vpop.f32.mrf.mxu0 }
 0xd35   :  { %906 = vrot.lane.b32.xlu0 %v898_v30, %s1260_s14 }
 0xd3c   :  { %v901_v15 = vpop.f32.mrf.mxu0 }
 0xd3d   :  { %908 = vrot.lane.b32.xlu1 %v901_v15, %s1260_s14  ;;  %960 = vrot.lane.b32.xlu0 %v869_v32, %s1257_s24 }
 0xd45   :  { %958 = vrot.lane.b32.xlu1 %v1600_v19, %s1257_s24  ;;  %1032 = vrot.lane.b32.xlu0 %v870_v51, %s1263_s26 }
 0xd4d   :  { %1231 = vrot.lane.b32.xlu1 %v1230_v31, %s1263_s26  ;;  %1037 = vrot.lane.b32.xlu0 %v1251_v59, %s1261_s19 }
 0xd55   :  { %1069 = vrot.lane.b32.xlu1 %v869_v32, %s1264_s29  ;;  %60 = vrot.lane.b32.xlu0 %v1139_v61, %s1262_s25 }
 0xda7   :  { %v907_v34 = vpop.permute.xlu0 %906 }
 0xda8   :  { %v912_v36 = vsel %vm187_vm8, %v892_v21, %v907_v34 }
 0xda9   :  { %v914_v37 = vsel %vm190_vm9, %v912_v36, %v1369_v35  ;;  %v919_v35 = vpop.permute.xlu2 %918 }
 0xdaa   :  { %1192 = vmatmul.msk.f32.vlgmr.msra.gmra.mxu2 %vm198_vm10, %v914_v37 }
 0xdaf   :  { %v909_v38 = vpop.permute.xlu1 %908  ;;  %v961_v42 = vpop.permute.xlu0 %960 }
 0xdb0   :  { %v913_v40 = vsel %vm187_vm8, %v895_v23, %v909_v38  ;;  %1194 = vmatpush.msk.msrb.mxu1 %vm252_vm11, %v961_v42 }
 0xdb1   :  { %v915_v41 = vsel %vm190_vm9, %v913_v40, %v1375_v39  ;;  %v965_v53 = vpop.permute.xlu2 %964 }
 0xdb2   :  { %1193 = vmatmul.msk.f32.gmra.mxu2 %vm198_vm10, %v915_v41 }
 0xdb7   :  { %v959_v43 = vpop.permute.xlu1 %958  ;;  %v1033_v62 = vpop.permute.xlu0 %1032 }
 0xdb8   :  { %990 = vmatpush.msrb.mxu1 %v959_v43 }
 0xdbf   :  { %v1232_v63 = vpop.permute.xlu1 %1231  ;;  %v1038_v3 = vpop.permute.xlu0 %1037 }
 0xdc0   :  { %v1234_v0 = vunpack.i.h.bf16 %v1232_v63 }
 0xdc7   :  { %v1070_v46 = vpop.permute.xlu1 %1069  ;;  %v61_v16 = vpop.permute.xlu0 %60 }
 0xdc8   :  { %1200 = vmatpush.msk.msrb.mxu2 %vm252_vm11, %v1070_v46  ;;  %v64_v4 = vsel %vm63_vm15, %v61_v16, 0.0 }
 0xdc9   :  { %65 = vadd.xlane.f32.xlu1 %v64_v4 }
 0xe2d   :  { %v947_v45 = vpop.f32.mrf.mxu2 }
 0xe2e   :  { %v948_v47 = vadd.f32 %v947_v45, %v919_v35 }
 0xe30   :  { %v953_v48 = vmax.f32 %v948_v47, 0.0 }
 0xe32   :  { %1195 = vmatmul.msk.f32.vlgmr.msrb.gmra.mxu1 %vm187_vm8, %v953_v48 }
 0xe35   :  { %v950_v39 = vpop.f32.mrf.mxu2 }
 0xe36   :  { %v951_v49 = vadd.f32 %v950_v39, %v919_v35 }
 0xe38   :  { %v954_v50 = vmax.f32 %v951_v49, 0.0 }
 0xe3a   :  { %1196 = vmatmul.msk.f32.gmra.mxu1 %vm187_vm8, %v954_v50 }
 0xe3c   :  { %v66_v7 = vpop.xlane.xlu1 %65 }
 0xe3d   :  { %v67_v8 = vmax.f32 %v66_v7, 1.0 }
 0xe3f   :  { %1254 = vrcp.f32 %v67_v8  ;;  %v79_v12 = vand.u32 2147483648, %v67_v8  ;;  %v77_v18 = vand.u32 2147483647, %v67_v8 }
 0xe41   :  { %v80_v22 = vor.u32 1.1754944e-38, %v79_v12  ;;  %vm78_vm4 = vcmp.eq.f32.partialorder %v77_v18, 8.507059e+37 }
 0xe45   :  { %v1255_v9 = vpop.eup %1254 }
 0xe46   :  { %v69_v11 = vmul.f32 %v1255_v9, %v67_v8  ;;  %vm74_vm1 = vweird.f32 %v1255_v9 }
 0xe48   :  { %v70_v14 = vsub.f32 1.0, %v69_v11 }
 0xe4a   :  { %v71_v20 = vmul.f32 %v1255_v9, %v70_v14 }
 0xe4c   :  { %v72_v24 = vadd.f32 %v1255_v9, %v71_v20 }
 0xeaf   :  { %v992_v52 = vpop.f32.mrf.mxu1 }
 0xeb0   :  { %v993_v55 = vadd.f32 %v992_v52, %v965_v53 }
 0xeb2   :  { %v998_v58 = vmax.f32 %v993_v55, 0.0 }
 0xeb7   :  { %v995_v54 = vpop.f32.mrf.mxu1 }
 0xeb8   :  { %v996_v56 = vadd.f32 %v995_v54, %v965_v53 }
 0xeba   :  { %v999_v57 = vmax.f32 %v996_v56, 0.0 }
 0xebc   :  { %1014 = vmatpush.msra.mxu3 %v999_v57 }
 0xebe   :  { %1015 = vmatpush.msra.mxu3 %v998_v58 }
 0xebf   :  { %1197 = vmatmul.msk.f32.vlgmr.msra.gmra.mxu3 %vm283_vm13, %v1403_v1  ;;  %v1233_v1 = vunpack.i.l.bf16 %v1232_v63 }
 0xec0   :  { %1198 = vmatpush.msk.msrb.mxu3 %vm95_vm0, %v1033_v62  ;;  %vm73_vm0 = vweird.f32 %v67_v8 }
 0xec1   :  { %vm75_vm2 = vmor %vm73_vm0, %vm74_vm1 }
 0xec2   :  { %1059 = vmatpush.msrb.mxu3 %v1233_v1  ;;  %v76_v25 = vsel %vm75_vm2, %v1255_v9, %v72_v24 }
 0xec3   :  { %v81_v26 = vsel %vm78_vm4, %v80_v22, %v76_v25 }
 0xec4   :  { %1060 = vmatpush.msrb.mxu3 %v1234_v0  ;;  %v82_v27 = vmul.f32 %v1139_v61, %v81_v26 }
 0xec6   :  { %1104 = vrot.lane.b32.xlu0 %v82_v27, %s1262_s25 }
 0xf38   :  { %v1105_v32 = vpop.permute.xlu0 %1104 }
 0xf42   :  { %v1017_v2 = vpop.f32.mrf.mxu3 }
 0xf43   :  { %1021 = vrot.lane.b32.xlu2 %v1017_v2, %s1260_s14 }
 0xf4b   :  { %1067 = vrot.lane.b32.xlu2 %v1600_v19, %s1264_s29 }
 0xf53   :  { %1073 = vrot.lane.b32.xlu2 %v1253_v13, %s1261_s19 }
 0xf9d   :  { %v1022_v5 = vpop.permute.xlu2 %1021 }
 0xf9e   :  { %v1024_v6 = vsel %vm187_vm8, %v1576_v29, %v1022_v5 }
 0xf9f   :  { %1199 = vmatmul.msk.f32.vlgmr.msrb.gmra.mxu3 %vm190_vm9, %v1024_v6 }
 0xfa5   :  { %v1068_v10 = vpop.permute.xlu2 %1067 }
 0xfa6   :  { %1096 = vmatpush.msrb.mxu2 %v1068_v10 }
 0xfad   :  { %v1074_v21 = vpop.permute.xlu2 %1073 }
0x1022   :  { %v1062_v28 = vpop.f32.mrf.mxu3 }
0x1023   :  { %v1063_v17 = vadd.f32 %v1062_v28, %v1038_v3 }
0x1025   :  { %v1065_v19 = vmax.f32 %v1063_v17, 0.0 }
0x1027   :  { %1201 = vmatmul.msk.f32.vlgmr.msrb.gmra.mxu2 %vm187_vm8, %v1065_v19 }
0x10aa   :  { %v1098_v23 = vpop.f32.mrf.mxu2 }
0x10ab   :  { %v1099_v30 = vadd.f32 %v1098_v23, %v1074_v21 }
0x10ad   :  { %v1101_v15 = vmax.f32 %v1099_v30, 0.0 }
0x10af   :  { %v1102_v31 = vadd.f32 %v1101_v15, %v1576_v29 }
0x10b1   :  { %1123 = vmatpush.msra.mxu1 %v1102_v31 }
0x10b2   :  { %1202 = vmatmul.msk.f32.vlgmr.msra.gmra.mxu1 %vm129_vm3, %v1105_v32 }
0x112f   :  { %v1125_v33 = vpop.f32.mrf.mxu1 }
0x1130   :  { %1129 = vst.msk [vmem:[%s1671_s3] sm:$0x3] %vm1128_vm5, %v1125_v33 }

</bundles_post_ra>
